<compile_context>
chip_gen: v7x
topology: tpu7x:2x2x1
jax: 0.10.0
libtpu: 0.0.40
codegen_flags: <defaults>
</compile_context>

<pallas_src>
import functools

import jax
import jax.numpy as jnp
from jax.experimental import pallas as pl
from jax.experimental.pallas import tpu as pltpu


def _round_up(v, m):
    return (v + m - 1) // m * m


def _pick_tile(total, cap):
    """Largest multiple of 128 that divides `total` (a multiple of 128) and is <= cap."""
    d = total // 128
    best = 1
    for dd in range(1, d + 1):
        if d % dd == 0 and dd * 128 <= cap:
            best = dd
    return best * 128


# ----------------------------------------------------------------------------
# Pass 1: conv-proj matmul + per-channel sum / sum-of-squares accumulation.
# ----------------------------------------------------------------------------
def _conv_stats_kernel(p_ref, w_ref, sum_ref, sq_ref):
    # p_ref: (K_pad, TM1) bf16, w_ref: (E_pad, K_pad) bf16
    # sum_ref / sq_ref: (E_pad, 1) f32, resident per leading ("core") grid axis.
    @pl.when((pl.program_id(1) == 0) & (pl.program_id(2) == 0))
    def _init():
        sum_ref[...] = jnp.zeros_like(sum_ref)
        sq_ref[...] = jnp.zeros_like(sq_ref)

    y = jnp.dot(w_ref[...], p_ref[...], preferred_element_type=jnp.float32)  # (E_pad, TM1)
    # Padded columns of `patches` are zero, so they contribute 0 to both sums;
    # the wrapper divides by the *real* element count.
    sum_ref[...] += jnp.sum(y, axis=1, keepdims=True)
    sq_ref[...] += jnp.sum(y * y, axis=1, keepdims=True)


# ----------------------------------------------------------------------------
# Pass 2: recompute matmul tile, normalize, lane-dense channel-major store.
# ----------------------------------------------------------------------------
def _conv_norm_kernel(p_ref, w_ref, scale_ref, shift_ref, o_ref):
    # p_ref: (K_pad, TM) bf16, w_ref: (E_pad, K_pad) bf16
    # scale_ref / shift_ref: (E_pad, 1) f32
    # o_ref: (E, TM) f32 (leading batch dim squeezed by the BlockSpec)
    y = jnp.dot(w_ref[...], p_ref[...], preferred_element_type=jnp.float32)  # (E_pad, TM)
    y = y * scale_ref[...] + shift_ref[...]                                  # f32 BN math
    o_ref[...] = y[: o_ref.shape[0], :].astype(o_ref.dtype)                 # drop E padding


# ----------------------------------------------------------------------------
# im2col, K-major: (N, K_pad, OHW_pad) bf16, feature order (c, kh, kw) matching
# the flattened PyTorch Conv2d weight (E, C, KH, KW).
# ----------------------------------------------------------------------------
def _im2col_kmajor(x, kh, kw, stride, pad, ohw_pad, k_pad, dtype):
    n, c, h, w = x.shape
    oh = (h + 2 * pad - kh) // stride + 1
    ow = (w + 2 * pad - kw) // stride + 1
    x = x.astype(dtype)  # cast BEFORE the slice/stack chain: halves im2col HBM traffic
    xp = jnp.pad(x, ((0, 0), (0, 0), (pad, pad), (pad, pad)))
    cols = []
    for i in range(kh):
        for j in range(kw):
            cols.append(xp[:, :, i:i + stride * oh:stride, j:j + stride * ow:stride])
    patches = jnp.stack(cols, axis=2)               # (N, C, KH*KW, OH, OW)
    k = c * kh * kw
    patches = patches.reshape(n, k, oh * ow)        # (N, K, OHW), K-major
    patches = jnp.pad(patches, ((0, 0), (0, k_pad - k), (0, ohw_pad - oh * ow)))
    return patches


@functools.partial(jax.jit, static_argnames=("patch_size", "stride"))
def overlap_patch_embed(x, weight, bias, gamma, beta, *, patch_size=7, stride=4):
    """Forward of OverlapPatchEmbed.

    x:      (N, C, H, W) f32 (NCHW, like PyTorch)
    weight: (E, C, KH, KW) f32 (PyTorch Conv2d layout)
    bias, gamma, beta: (E,) f32
    Returns (y, H_out, W_out) with y in NCHW: (N, E, OH, OW) f32.
    """
    del bias  # exactly cancelled by training-mode BN mean subtraction

    n, c, h, w_in = x.shape
    e, cw, kh, kw = weight.shape
    assert cw == c and kh == patch_size and kw == patch_size
    pad = patch_size // 2

    oh = (h + 2 * pad - kh) // stride + 1
    ow = (w_in + 2 * pad - kw) // stride + 1
    ohw = oh * ow
    k = c * kh * kw

    ohw_pad = _round_up(ohw, 128)   # minimal padding: 128-multiple only
    k_pad = _round_up(k, 128)
    e_pad = _round_up(e, 128)

    # Pass-2 tile: largest 128-multiple divisor of ohw_pad <= 1024 (lane-dense store).
    tm = _pick_tile(ohw_pad, 1024)
    tiles_per_batch = ohw_pad // tm

    # Pass-1 tile: independent; as large as possible under ~12 MiB double-buffer budget.
    tm1_cap = max(128, min(2048, (12 << 20) // max(1, k_pad * 4)))
    tm1 = _pick_tile(ohw_pad, tm1_cap)
    tiles1_per_batch = ohw_pad // tm1

    # v7x megacore split of pass 1 (per-core partial stats); no-op on 1-TC chips.
    if tiles1_per_batch % 2 == 0:
        ncore, tpc, npc = 2, tiles1_per_batch // 2, n
        p1_map = lambda cidx, b, j: (b, 0, cidx * tpc + j)
    elif n % 2 == 0:
        ncore, tpc, npc = 2, tiles1_per_batch, n // 2
        p1_map = lambda cidx, b, j: (cidx * npc + b, 0, j)
    else:
        ncore, tpc, npc = 1, tiles1_per_batch, n
        p1_map = lambda cidx, b, j: (b, 0, j)

    # bf16 streaming operands (halves HBM traffic; f32 MXU accumulation).
    patches = _im2col_kmajor(x, kh, kw, stride, pad, ohw_pad, k_pad, jnp.bfloat16)
    w2d = weight.reshape(e, k)                                        # (E, K) — no transpose
    w2d = jnp.pad(w2d, ((0, e_pad - e), (0, k_pad - k))).astype(jnp.bfloat16)

    vmem_limit = 32 * 1024 * 1024

    # -------- Pass 1: per-channel batch statistics ---------------------------
    ch_sum, ch_sq = pl.pallas_call(
        _conv_stats_kernel,
        grid=(ncore, npc, tpc),
        in_specs=[
            pl.BlockSpec((None, k_pad, tm1), p1_map),
            pl.BlockSpec((e_pad, k_pad), lambda cidx, b, j: (0, 0)),
        ],
        out_specs=(
            pl.BlockSpec((None, e_pad, 1), lambda cidx, b, j: (cidx, 0, 0)),
            pl.BlockSpec((None, e_pad, 1), lambda cidx, b, j: (cidx, 0, 0)),
        ),
        out_shape=(
            jax.ShapeDtypeStruct((ncore, e_pad, 1), jnp.float32),
            jax.ShapeDtypeStruct((ncore, e_pad, 1), jnp.float32),
        ),
        compiler_params=pltpu.CompilerParams(
            dimension_semantics=("parallel", "arbitrary", "arbitrary"),
            vmem_limit_bytes=vmem_limit),
    )(patches, w2d)

    # -------- Tiny per-channel scale/shift (plain JAX, f32) ------------------
    # E[x^2]-E[x]^2 in f32 is acceptable for O(1) activations; padded channels
    # have sum=sq=0 -> var=0 -> rsqrt(eps) stays finite, and gamma pad = 0.
    m_real = jnp.float32(n * ohw)
    s_tot = jnp.sum(ch_sum, axis=0)                     # (E_pad, 1)
    sq_tot = jnp.sum(ch_sq, axis=0)                     # (E_pad, 1)
    mean = s_tot / m_real
    var = jnp.maximum(sq_tot / m_real - mean * mean, 0.0)
    inv = jax.lax.rsqrt(var + 1e-5)
    g = jnp.pad(gamma.astype(jnp.float32), (0, e_pad - e)).reshape(e_pad, 1)
    bt = jnp.pad(beta.astype(jnp.float32), (0, e_pad - e)).reshape(e_pad, 1)
    scale = inv * g                                     # gamma folded into rsqrt
    shift = bt - mean * scale

    # -------- Pass 2: normalize + lane-dense NCHW-layout store ---------------
    out_p = pl.pallas_call(
        _conv_norm_kernel,
        grid=(n, tiles_per_batch),
        in_specs=[
            pl.BlockSpec((None, k_pad, tm), lambda b, j: (b, 0, j)),
            pl.BlockSpec((e_pad, k_pad), lambda b, j: (0, 0)),
            pl.BlockSpec((e_pad, 1), lambda b, j: (0, 0)),
            pl.BlockSpec((e_pad, 1), lambda b, j: (0, 0)),
        ],
        out_specs=pl.BlockSpec((None, e, tm), lambda b, j: (b, 0, j)),
        out_shape=jax.ShapeDtypeStruct((n, e, ohw_pad), jnp.float32),
        compiler_params=pltpu.CompilerParams(
            dimension_semantics=("parallel", "parallel"),
            vmem_limit_bytes=vmem_limit),
    )(patches, w2d, scale, shift)

    if ohw_pad == ohw:
        y = out_p.reshape(n, e, oh, ow)          # no copy when OHW is a 128-multiple
    else:
        y = out_p[:, :, :ohw].reshape(n, e, oh, ow)
    return y, oh, ow


if __name__ == "__main__":
    # Small, module-consistent shapes: batch=2, in_chans=4, spatial=16,
    # embed_dim=32, patch_size=7, stride=4 -> output (2, 32, 4, 4).
    key = jax.random.PRNGKey(0)
    k_x, k_w, k_b = jax.random.split(key, 3)

    N, C, H, W = 2, 4, 16, 16
    E, P, S = 32, 7, 4

    x = jax.random.normal(k_x, (N, C, H, W), dtype=jnp.float32)
    fan_in = C * P * P
    weight = jax.random.normal(k_w, (E, C, P, P), dtype=jnp.float32) * (fan_in ** -0.5)
    bias = jax.random.normal(k_b, (E,), dtype=jnp.float32) * 0.01
    gamma = jnp.ones((E,), dtype=jnp.float32)   # BatchNorm2d default weight
    beta = jnp.zeros((E,), dtype=jnp.float32)   # BatchNorm2d default bias

    y, oh, ow = overlap_patch_embed(x, weight, bias, gamma, beta,
                                    patch_size=P, stride=S)
    jax.block_until_ready(y)
    assert y.shape == (N, E, int(oh), int(ow)) == (2, 32, 4, 4)
    print("KERNEL_OK")
</pallas_src>

<mosaic_0001>
module attributes {stable_mosaic.version = 11 : i64} {
  func.func @_conv_stats_kernel(%arg0: i32, %arg1: i32, %arg2: i32, %arg3: memref<1x256x128xbf16, #tpu.memory_space<vmem>>, %arg4: memref<128x256xbf16, #tpu.memory_space<vmem>>, %arg5: memref<1x128x1xf32, #tpu.memory_space<vmem>>, %arg6: memref<1x128x1xf32, #tpu.memory_space<vmem>>) attributes {dimension_semantics = [#tpu.dimension_semantics<parallel>, #tpu.dimension_semantics<arbitrary>, #tpu.dimension_semantics<arbitrary>], iteration_bounds = array<i64: 2, 1, 1>, scalar_prefetch = 0 : i64, scratch_operands = 0 : i64, tpu.core_type = #tpu.core_type<tc>, window_params = [{transform_indices = @transform_0, window_bounds = array<i64: 1, 256, 128>}, {pipeline_mode = #tpu.pipeline_mode<synchronous>, transform_indices = @transform_1, window_bounds = array<i64: 128, 256>}, {transform_indices = @transform_2, window_bounds = array<i64: 1, 128, 1>}, {transform_indices = @transform_3, window_bounds = array<i64: 1, 128, 1>}]} {
    %c0_i32 = arith.constant 0 : i32
    %0 = arith.cmpi eq, %arg1, %c0_i32 : i32
    %c0_i32_0 = arith.constant 0 : i32
    %1 = arith.cmpi eq, %arg2, %c0_i32_0 : i32
    %2 = arith.andi %0, %1 : i1
    %3 = arith.extui %2 : i1 to i32
    %c0_i32_1 = arith.constant 0 : i32
    %4 = arith.cmpi ne, %3, %c0_i32_1 : i32
    scf.if %4 {
      %cst_20 = arith.constant 0.000000e+00 : f32
      %26 = vector.broadcast %cst_20 : f32 to vector<128x1xf32>
      %c0_21 = arith.constant 0 : index
      %c0_22 = arith.constant 0 : index
      %c0_23 = arith.constant 0 : index
      %27 = vector.load %arg5[%c0_21, %c0_22, %c0_23] : memref<1x128x1xf32, #tpu.memory_space<vmem>>, vector<1x128x1xf32>
      %28 = vector.shape_cast %27 : vector<1x128x1xf32> to vector<128x1xf32>
      %29 = vector.shape_cast %26 : vector<128x1xf32> to vector<1x128x1xf32>
      tpu.vector_store %arg5[%c0_21, %c0_22, %c0_23], %29 {strides = array<i32>} : memref<1x128x1xf32, #tpu.memory_space<vmem>>, vector<1x128x1xf32>,
      %cst_24 = arith.constant 0.000000e+00 : f32
      %30 = vector.broadcast %cst_24 : f32 to vector<128x1xf32>
      %c0_25 = arith.constant 0 : index
      %c0_26 = arith.constant 0 : index
      %c0_27 = arith.constant 0 : index
      %31 = vector.load %arg6[%c0_25, %c0_26, %c0_27] : memref<1x128x1xf32, #tpu.memory_space<vmem>>, vector<1x128x1xf32>
      %32 = vector.shape_cast %31 : vector<1x128x1xf32> to vector<128x1xf32>
      %33 = vector.shape_cast %30 : vector<128x1xf32> to vector<1x128x1xf32>
      tpu.vector_store %arg6[%c0_25, %c0_26, %c0_27], %33 {strides = array<i32>} : memref<1x128x1xf32, #tpu.memory_space<vmem>>, vector<1x128x1xf32>,
    } else {
    }
    %c0 = arith.constant 0 : index
    %c0_2 = arith.constant 0 : index
    %5 = vector.load %arg4[%c0, %c0_2] : memref<128x256xbf16, #tpu.memory_space<vmem>>, vector<128x256xbf16>
    %c0_3 = arith.constant 0 : index
    %c0_4 = arith.constant 0 : index
    %c0_5 = arith.constant 0 : index
    %6 = vector.load %arg3[%c0_3, %c0_4, %c0_5] : memref<1x256x128xbf16, #tpu.memory_space<vmem>>, vector<1x256x128xbf16>
    %7 = vector.shape_cast %6 : vector<1x256x128xbf16> to vector<256x128xbf16>
    %cst = arith.constant dense<0.000000e+00> : vector<128x128xf32>
    %8 = tpu.matmul %5, %7, %cst {dimension_numbers = #tpu.dot_dimension_numbers<[1], [0], [0], [1], [0, 0, 1, 1], [], []>} : vector<128x256xbf16>, vector<256x128xbf16>, vector<128x128xf32> -> vector<128x128xf32>
    %c0_6 = arith.constant 0 : index
    %c0_7 = arith.constant 0 : index
    %c0_8 = arith.constant 0 : index
    %9 = vector.load %arg5[%c0_6, %c0_7, %c0_8] : memref<1x128x1xf32, #tpu.memory_space<vmem>>, vector<1x128x1xf32>
    %10 = vector.shape_cast %9 : vector<1x128x1xf32> to vector<128x1xf32>
    %cst_9 = arith.constant dense<0.000000e+00> : vector<128xf32>
    %11 = vector.multi_reduction <add>, %8, %cst_9 [1] : vector<128x128xf32> to vector<128xf32>
    %12 = vector.shape_cast %11 : vector<128xf32> to vector<128x1xf32>
    %13 = arith.addf %10, %12 : vector<128x1xf32>
    %c0_10 = arith.constant 0 : index
    %c0_11 = arith.constant 0 : index
    %c0_12 = arith.constant 0 : index
    %14 = vector.load %arg5[%c0_10, %c0_11, %c0_12] : memref<1x128x1xf32, #tpu.memory_space<vmem>>, vector<1x128x1xf32>
    %15 = vector.shape_cast %14 : vector<1x128x1xf32> to vector<128x1xf32>
    %16 = vector.shape_cast %13 : vector<128x1xf32> to vector<1x128x1xf32>
    tpu.vector_store %arg5[%c0_10, %c0_11, %c0_12], %16 {strides = array<i32>} : memref<1x128x1xf32, #tpu.memory_space<vmem>>, vector<1x128x1xf32>,
    %c0_13 = arith.constant 0 : index
    %c0_14 = arith.constant 0 : index
    %c0_15 = arith.constant 0 : index
    %17 = vector.load %arg6[%c0_13, %c0_14, %c0_15] : memref<1x128x1xf32, #tpu.memory_space<vmem>>, vector<1x128x1xf32>
    %18 = vector.shape_cast %17 : vector<1x128x1xf32> to vector<128x1xf32>
    %19 = arith.mulf %8, %8 : vector<128x128xf32>
    %cst_16 = arith.constant dense<0.000000e+00> : vector<128xf32>
    %20 = vector.multi_reduction <add>, %19, %cst_16 [1] : vector<128x128xf32> to vector<128xf32>
    %21 = vector.shape_cast %20 : vector<128xf32> to vector<128x1xf32>
    %22 = arith.addf %18, %21 : vector<128x1xf32>
    %c0_17 = arith.constant 0 : index
    %c0_18 = arith.constant 0 : index
    %c0_19 = arith.constant 0 : index
    %23 = vector.load %arg6[%c0_17, %c0_18, %c0_19] : memref<1x128x1xf32, #tpu.memory_space<vmem>>, vector<1x128x1xf32>
    %24 = vector.shape_cast %23 : vector<1x128x1xf32> to vector<128x1xf32>
    %25 = vector.shape_cast %22 : vector<128x1xf32> to vector<1x128x1xf32>
    tpu.vector_store %arg6[%c0_17, %c0_18, %c0_19], %25 {strides = array<i32>} : memref<1x128x1xf32, #tpu.memory_space<vmem>>, vector<1x128x1xf32>,
    return
  }
  func.func @transform_0(%arg0: i32, %arg1: i32, %arg2: i32) -> (i32, i32, i32) {
    %c1_i32 = arith.constant 1 : i32
    %0 = arith.muli %arg0, %c1_i32 : i32
    %1 = arith.addi %0, %arg1 : i32
    %c0_i32 = arith.constant 0 : i32
    %c0_i32_0 = arith.constant 0 : i32
    return %1, %c0_i32, %arg2 : i32, i32, i32
  }
  func.func @transform_1(%arg0: i32, %arg1: i32, %arg2: i32) -> (i32, i32) {
    %c0_i32 = arith.constant 0 : i32
    %c0_i32_0 = arith.constant 0 : i32
    %c0_i32_1 = arith.constant 0 : i32
    return %c0_i32, %c0_i32_0 : i32, i32
  }
  func.func @transform_2(%arg0: i32, %arg1: i32, %arg2: i32) -> (i32, i32, i32) {
    %c0_i32 = arith.constant 0 : i32
    %c0_i32_0 = arith.constant 0 : i32
    %c0_i32_1 = arith.constant 0 : i32
    return %arg0, %c0_i32, %c0_i32_0 : i32, i32, i32
  }
  func.func @transform_3(%arg0: i32, %arg1: i32, %arg2: i32) -> (i32, i32, i32) {
    %c0_i32 = arith.constant 0 : i32
    %c0_i32_0 = arith.constant 0 : i32
    %c0_i32_1 = arith.constant 0 : i32
    return %arg0, %c0_i32, %c0_i32_0 : i32, i32, i32
  }
}

module attributes {stable_mosaic.version = 11 : i64} {
  func.func @_conv_norm_kernel(%arg0: i32, %arg1: i32, %arg2: memref<1x256x128xbf16, #tpu.memory_space<vmem>>, %arg3: memref<128x256xbf16, #tpu.memory_space<vmem>>, %arg4: memref<128x1xf32, #tpu.memory_space<vmem>>, %arg5: memref<128x1xf32, #tpu.memory_space<vmem>>, %arg6: memref<1x32x128xf32, #tpu.memory_space<vmem>>) attributes {dimension_semantics = [#tpu.dimension_semantics<parallel>, #tpu.dimension_semantics<parallel>], iteration_bounds = array<i64: 2, 1>, scalar_prefetch = 0 : i64, scratch_operands = 0 : i64, tpu.core_type = #tpu.core_type<tc>, window_params = [{transform_indices = @transform_0, window_bounds = array<i64: 1, 256, 128>}, {pipeline_mode = #tpu.pipeline_mode<synchronous>, transform_indices = @transform_1, window_bounds = array<i64: 128, 256>}, {pipeline_mode = #tpu.pipeline_mode<synchronous>, transform_indices = @transform_2, window_bounds = array<i64: 128, 1>}, {pipeline_mode = #tpu.pipeline_mode<synchronous>, transform_indices = @transform_3, window_bounds = array<i64: 128, 1>}, {transform_indices = @transform_4, window_bounds = array<i64: 1, 32, 128>}]} {
    %c0 = arith.constant 0 : index
    %c0_0 = arith.constant 0 : index
    %0 = vector.load %arg3[%c0, %c0_0] : memref<128x256xbf16, #tpu.memory_space<vmem>>, vector<128x256xbf16>
    %c0_1 = arith.constant 0 : index
    %c0_2 = arith.constant 0 : index
    %c0_3 = arith.constant 0 : index
    %1 = vector.load %arg2[%c0_1, %c0_2, %c0_3] : memref<1x256x128xbf16, #tpu.memory_space<vmem>>, vector<1x256x128xbf16>
    %2 = vector.shape_cast %1 : vector<1x256x128xbf16> to vector<256x128xbf16>
    %cst = arith.constant dense<0.000000e+00> : vector<128x128xf32>
    %3 = tpu.matmul %0, %2, %cst {dimension_numbers = #tpu.dot_dimension_numbers<[1], [0], [0], [1], [0, 0, 1, 1], [], []>} : vector<128x256xbf16>, vector<256x128xbf16>, vector<128x128xf32> -> vector<128x128xf32>
    %c0_4 = arith.constant 0 : index
    %c0_5 = arith.constant 0 : index
    %4 = vector.load %arg4[%c0_4, %c0_5] : memref<128x1xf32, #tpu.memory_space<vmem>>, vector<128x1xf32>
    %5 = vector.broadcast %4 : vector<128x1xf32> to vector<128x128xf32>
    %6 = arith.mulf %3, %5 : vector<128x128xf32>
    %c0_6 = arith.constant 0 : index
    %c0_7 = arith.constant 0 : index
    %7 = vector.load %arg5[%c0_6, %c0_7] : memref<128x1xf32, #tpu.memory_space<vmem>>, vector<128x1xf32>
    %8 = vector.broadcast %7 : vector<128x1xf32> to vector<128x128xf32>
    %9 = arith.addf %6, %8 : vector<128x128xf32>
    %10 = vector.extract_strided_slice %9 {offsets = [0, 0], sizes = [32, 128], strides = [1, 1]} : vector<128x128xf32> to vector<32x128xf32>
    %c0_8 = arith.constant 0 : index
    %c0_9 = arith.constant 0 : index
    %c0_10 = arith.constant 0 : index
    %11 = vector.load %arg6[%c0_8, %c0_9, %c0_10] : memref<1x32x128xf32, #tpu.memory_space<vmem>>, vector<1x32x128xf32>
    %12 = vector.shape_cast %11 : vector<1x32x128xf32> to vector<32x128xf32>
    %13 = vector.shape_cast %10 : vector<32x128xf32> to vector<1x32x128xf32>
    tpu.vector_store %arg6[%c0_8, %c0_9, %c0_10], %13 {strides = array<i32>} : memref<1x32x128xf32, #tpu.memory_space<vmem>>, vector<1x32x128xf32>,
    return
  }
  func.func @transform_0(%arg0: i32, %arg1: i32) -> (i32, i32, i32) {
    %c0_i32 = arith.constant 0 : i32
    %c0_i32_0 = arith.constant 0 : i32
    return %arg0, %c0_i32, %arg1 : i32, i32, i32
  }
  func.func @transform_1(%arg0: i32, %arg1: i32) -> (i32, i32) {
    %c0_i32 = arith.constant 0 : i32
    %c0_i32_0 = arith.constant 0 : i32
    %c0_i32_1 = arith.constant 0 : i32
    return %c0_i32, %c0_i32_0 : i32, i32
  }
  func.func @transform_2(%arg0: i32, %arg1: i32) -> (i32, i32) {
    %c0_i32 = arith.constant 0 : i32
    %c0_i32_0 = arith.constant 0 : i32
    %c0_i32_1 = arith.constant 0 : i32
    return %c0_i32, %c0_i32_0 : i32, i32
  }
  func.func @transform_3(%arg0: i32, %arg1: i32) -> (i32, i32) {
    %c0_i32 = arith.constant 0 : i32
    %c0_i32_0 = arith.constant 0 : i32
    %c0_i32_1 = arith.constant 0 : i32
    return %c0_i32, %c0_i32_0 : i32, i32
  }
  func.func @transform_4(%arg0: i32, %arg1: i32) -> (i32, i32, i32) {
    %c0_i32 = arith.constant 0 : i32
    %c0_i32_0 = arith.constant 0 : i32
    return %arg0, %c0_i32, %arg1 : i32, i32, i32
  }
}

</mosaic_0001>

<bundles_post_ra>
// kernel: overlap_patch_embed.3
= control target key start
LH: loop header
LB: loop body
LE: loop exit
PB: predicated region body
PF: predicated region fallthrough
CT: control target
= control target key end

     0   :  { %s924_s15 = smov 0   ;;  %s926_s16 = smov 0   ;;  %s1051_s0 = inlined_call_operand.vmem [shape: bf16[2,256,128], index: 0, kind: input, shape index: {}]   ;;  %s1052_s1 = inlined_call_operand.vmem [shape: bf16[128,256], index: 1, kind: input, shape index: {}]   ;;  %s1053_s2 = inlined_call_operand.vmem [shape: f32[128,1], index: 2, kind: input, shape index: {}]   ;;  %s1054_s3 = inlined_call_operand.vmem [shape: f32[128,1], index: 3, kind: input, shape index: {}]   ;;  %s1055_s4 = inlined_call_operand.vmem [shape: f32[2,32,128], index: 4, kind: output, shape index: {}]  }
   0x1   :  { %s928_s17 = smov 0  }
   0x2 LB: > { %s26_s18 = sadd.s32 1, %s892_s16  ;;  %p686_p0 = scmp.ge.s32.totalorder %s896_s17, 1  ;;  %s896_s17 = sphi %s928_s17, %s14_s17   ;;  %s892_s16 = sphi %s926_s16, %s1057_s16   ;;  %s888_s15 = sphi %s924_s15, %s1056_s15  }
   0x3   : > { %p28_p1 = scmp.ge.s32.totalorder %s26_s18, 2  ;;  %p181_p2 = scmp.lt.s32.totalorder %s896_s17, 3 }
   0x5   : > { %s1059_s18 = smov (%p28_p1, %s26_s18), 0  ;;  %p182_p3 = pnand %p686_p0, %p181_p2 }
   0x6   : > { %p213_p4 = scmp.lt.s32.totalorder (!%p182_p3), %s888_s15, 1  ;;  %v852_v0 = vld [vmem:[%s1052_s1 + $0x4] ss:$8 sps:$4 sm:$0xff] (!%p182_p3)   ;;  %v898_v1 = vmov (!%p182_p3), 0   ;;  %v541_v17 = vld [vmem:[%s1053_s2 + $0x10] sm:$0xff] (!%p182_p3)  ;;  %v542_v20 = vld [vmem:[%s1053_s2 + $0x18] sm:$0xff] (!%p182_p3) }
   0x7   : > { %185 = sbr.rel (%p182_p3) target bundleno = 289 (0x121), region = 36  ;;  %832 = vset.pattern.permute.xlu0 (!%p182_p3), %v898_v1  ;;  %833 = vset.pattern.permute.xlu1 (!%p182_p3), %v898_v1  ;;  %v855_v2 = vld [vmem:[%s1052_s1 + $0x44] ss:$8 sps:$4 sm:$0xff] (!%p182_p3)   ;;  %v850_v25 = vld [vmem:[%s1052_s1] ss:$8 sps:$4 sm:$0xff] (!%p182_p3)   ;;  %v569_v27 = vld [vmem:[%s1054_s3 + $0x10] sm:$0xff] (!%p182_p3) }
   0x8   : > { %486 = vmatprep.mubr.bf16.mxu0 (!%p182_p3), %v852_v0  ;;  %514 = vmatprep.mubr.bf16.mxu1 (!%p182_p3), %v855_v2  ;;  %v539_v16 = vld [vmem:[%s1053_s2] sm:$0xff] (!%p182_p3)  ;;  %v540_v18 = vld [vmem:[%s1053_s2 + $0x8] sm:$0xff] (!%p182_p3)  ;;  %v856_v28 = vld [vmem:[%s1052_s1 + $0x14] ss:$8 sps:$4 sm:$0xff] (!%p182_p3)  }
   0x9   : > { %545 = vperm.xlu0 (!%p182_p3), %832, %v539_v16   ;;  %555 = vperm.xlu1 (!%p182_p3), %833, %v541_v17   ;;  %v567_v22 = vld [vmem:[%s1054_s3] sm:$0xff] (!%p182_p3)  ;;  %v568_v24 = vld [vmem:[%s1054_s3 + $0x8] sm:$0xff] (!%p182_p3)  ;;  %v858_v29 = vld [vmem:[%s1052_s1 + $0x54] ss:$8 sps:$4 sm:$0xff] (!%p182_p3)  }
   0xa   : > { %v853_v26 = vld [vmem:[%s1052_s1 + $0x40] ss:$8 sps:$4 sm:$0xff] (!%p182_p3)   ;;  %v570_v30 = vld [vmem:[%s1054_s3 + $0x18] sm:$0xff] (!%p182_p3)  ;;  %v862_v33 = vld [vmem:[%s1052_s1 + $0x24] ss:$8 sps:$4 sm:$0xff] (!%p182_p3)  }
   0xb   : > { %v860_v31 = vld [vmem:[%s1052_s1 + $0x10] ss:$8 sps:$4 sm:$0xff] (!%p182_p3)   ;;  %v864_v34 = vld [vmem:[%s1052_s1 + $0x64] ss:$8 sps:$4 sm:$0xff] (!%p182_p3)   ;;  %v866_v35 = vld [vmem:[%s1052_s1 + $0x20] ss:$8 sps:$4 sm:$0xff] (!%p182_p3)  }
   0xc   : > { %v861_v32 = vld [vmem:[%s1052_s1 + $0x50] ss:$8 sps:$4 sm:$0xff] (!%p182_p3)   ;;  %v867_v36 = vld [vmem:[%s1052_s1 + $0x60] ss:$8 sps:$4 sm:$0xff] (!%p182_p3)   ;;  %v868_v37 = vld [vmem:[%s1052_s1 + $0x34] ss:$8 sps:$4 sm:$0xff] (!%p182_p3)  }
   0xd   : > { %550 = vperm.xlu0 (!%p182_p3), %832, %v540_v18   ;;  %560 = vperm.xlu1 (!%p182_p3), %833, %v542_v20   ;;  %v870_v38 = vld [vmem:[%s1052_s1 + $0x74] ss:$8 sps:$4 sm:$0xff] (!%p182_p3)   ;;  %v872_v39 = vld [vmem:[%s1052_s1 + $0x30] ss:$8 sps:$4 sm:$0xff] (!%p182_p3)  }
   0xe   : > { %s1061_s15 = smov (!%p213_p4, %s888_s15), 1  ;;  %v873_v40 = vld [vmem:[%s1052_s1 + $0x70] ss:$8 sps:$4 sm:$0xff]  }
   0xf   : > { %s725_s23 = sshll.u32 %s1061_s15, 7  ;;  %s726_s27 = sshll.u32 %s1061_s15, 5 }
  0x10   : > { %s954_s26 = scalar_lea.vmem %s1051_s0, %s725_s23  ;;  %s228_s30 = scalar_lea.vmem %s1055_s4, %s726_s27 }
  0x11   : > { %v834_v3 = vld [vmem:[%s954_s26 + $0x40] sm:$0xff]   ;;  %v836_v5 = vld [vmem:[%s954_s26 + $0x48] sm:$0xff]   ;;  %v838_v7 = vld [vmem:[%s954_s26 + $0x50] sm:$0xff]   ;;  %573 = vperm.xlu0 %832, %v567_v22   ;;  %578 = vperm.xlu1 %833, %v568_v24  }
  0x12   : > { %v835_v4 = vld [vmem:[%s954_s26] sm:$0xff]   ;;  %727 = vmatprep.subr.bf16.mxu0 %v834_v3  ;;  %791 = vmatprep.subr.bf16.mxu1 %v834_v3  ;;  %v837_v6 = vld [vmem:[%s954_s26 + $0x8] sm:$0xff]   ;;  %v839_v8 = vld [vmem:[%s954_s26 + $0x10] sm:$0xff]  }
  0x13   : > { %728 = vmatpush3.bf16.msra.mxu0 %v835_v4  ;;  %799 = vmatpush3.bf16.msra.mxu1 %v835_v4  ;;  %v840_v9 = vld [vmem:[%s954_s26 + $0x58] sm:$0xff]   ;;  %v842_v11 = vld [vmem:[%s954_s26 + $0x60] sm:$0xff]   ;;  %v844_v13 = vld [vmem:[%s954_s26 + $0x68] sm:$0xff]  }
  0x14   : > { %729 = vmatprep.subr.bf16.mxu0 %v836_v5  ;;  %792 = vmatprep.subr.bf16.mxu1 %v836_v5  ;;  %v841_v10 = vld [vmem:[%s954_s26 + $0x18] sm:$0xff]   ;;  %v843_v12 = vld [vmem:[%s954_s26 + $0x20] sm:$0xff]   ;;  %v845_v14 = vld [vmem:[%s954_s26 + $0x28] sm:$0xff]  }
  0x15   : > { %v846_v15 = vld [vmem:[%s954_s26 + $0x70] sm:$0xff]   ;;  %v848_v21 = vld [vmem:[%s954_s26 + $0x78] sm:$0xff]   ;;  %583 = vperm.xlu0 %832, %v569_v27   ;;  %588 = vperm.xlu1 %833, %v570_v30  }
  0x16   : > { %v847_v19 = vld [vmem:[%s954_s26 + $0x30] sm:$0xff]   ;;  %v849_v23 = vld [vmem:[%s954_s26 + $0x38] sm:$0xff]  }
  0x17   : > { %730 = vmatpush3.bf16.msra.mxu0 %v837_v6  ;;  %800 = vmatpush3.bf16.msra.mxu1 %v837_v6 }
  0x18   : > { %731 = vmatprep.subr.bf16.mxu0 %v838_v7  ;;  %793 = vmatprep.subr.bf16.mxu1 %v838_v7 }
  0x1b   : > { %732 = vmatpush3.bf16.msra.mxu0 %v839_v8  ;;  %801 = vmatpush3.bf16.msra.mxu1 %v839_v8 }
  0x1c   : > { %733 = vmatprep.subr.bf16.mxu0 %v840_v9  ;;  %794 = vmatprep.subr.bf16.mxu1 %v840_v9 }
  0x1f   : > { %734 = vmatpush3.bf16.msra.mxu0 %v841_v10  ;;  %802 = vmatpush3.bf16.msra.mxu1 %v841_v10 }
  0x20   : > { %735 = vmatprep.subr.bf16.mxu0 %v842_v11  ;;  %795 = vmatprep.subr.bf16.mxu1 %v842_v11 }
  0x23   : > { %736 = vmatpush3.bf16.msra.mxu0 %v843_v12  ;;  %803 = vmatpush3.bf16.msra.mxu1 %v843_v12 }
  0x24   : > { %737 = vmatprep.subr.bf16.mxu0 %v844_v13  ;;  %796 = vmatprep.subr.bf16.mxu1 %v844_v13 }
  0x27   : > { %738 = vmatpush3.bf16.msra.mxu0 %v845_v14  ;;  %804 = vmatpush3.bf16.msra.mxu1 %v845_v14 }
  0x28   : > { %739 = vmatprep.subr.bf16.mxu0 %v846_v15  ;;  %797 = vmatprep.subr.bf16.mxu1 %v846_v15 }
  0x2b   : > { %740 = vmatpush3.bf16.msra.mxu0 %v847_v19  ;;  %805 = vmatpush3.bf16.msra.mxu1 %v847_v19 }
  0x2c   : > { %741 = vmatprep.subr.bf16.mxu0 %v848_v21  ;;  %798 = vmatprep.subr.bf16.mxu1 %v848_v21 }
  0x2f   : > { %742 = vmatpush3.bf16.msra.mxu0 %v849_v23  ;;  %806 = vmatpush3.bf16.msra.mxu1 %v849_v23 }
  0x32   : > { %487 = vmatmul.mubr.bf16.vlgmr.msra.gmra.mrb[0].mxu0 %v850_v25  ;;  %515 = vmatmul.mubr.bf16.vlgmr.msra.gmra.mrb[0].mxu1 %v853_v26 }
  0x33   : > { %494 = vmatprep.mubr.bf16.mxu0 %v856_v28  ;;  %520 = vmatprep.mubr.bf16.mxu1 %v858_v29 }
  0x3a   : > { %495 = vmatmul.mubr.bf16.gmra.mrb[4].mxu0 %v860_v31  ;;  %521 = vmatmul.mubr.bf16.gmra.mrb[4].mxu1 %v861_v32 }
  0x3b   : > { %502 = vmatprep.mubr.bf16.mxu0 %v862_v33  ;;  %526 = vmatprep.mubr.bf16.mxu1 %v864_v34 }
  0x42   : > { %503 = vmatmul.mubr.bf16.gmra.mrb[8].mxu0 %v866_v35  ;;  %527 = vmatmul.mubr.bf16.gmra.mrb[8].mxu1 %v867_v36 }
  0x43   : > { %508 = vmatprep.mubr.bf16.mxu0 %v868_v37  ;;  %532 = vmatprep.mubr.bf16.mxu1 %v870_v38 }
  0x4a   : > { %509 = vmatmul.mubr.bf16.gmra.mrb[12].mxu0 %v872_v39  ;;  %533 = vmatmul.mubr.bf16.gmra.mrb[12].mxu1 %v873_v40 }
  0x88   : > { %v546_v41 = vpop.permute.xlu0 %545  ;;  %v556_v42 = vpop.permute.xlu1 %555 }
  0x8c   : > { %v551_v43 = vpop.permute.xlu0 %550  ;;  %v561_v44 = vpop.permute.xlu1 %560 }
  0x90   : > { %v574_v45 = vpop.permute.xlu0 %573  ;;  %v579_v57 = vpop.permute.xlu1 %578 }
  0x94   : > { %v584_v60 = vpop.permute.xlu0 %583  ;;  %v589_v11 = vpop.permute.xlu1 %588 }
 0x105   : > { %v743_v46 = vpop.f32.mrb[0].mxu0  ;;  %v767_v47 = vpop.f32.mrb[0].mxu1 }
 0x106   : > { %v744_v48 = vpop.f32.mrb[1].mxu0  ;;  %v768_v49 = vpop.f32.mrb[1].mxu1 }
 0x107   : > { %v745_v50 = vadd.f32 %v744_v48, %v743_v46  ;;  %v746_v51 = vpop.f32.mrb[2].mxu0  ;;  %v770_v52 = vpop.f32.mrb[2].mxu1 }
 0x108   : > { %v747_v53 = vpop.f32.mrb[3].mxu0  ;;  %v771_v54 = vpop.f32.mrb[3].mxu1 }
 0x109   : > { %v748_v55 = vadd.f32 %v747_v53, %v746_v51  ;;  %v563_v56 = vmul.f32 %v745_v50, %v546_v41 }
 0x10b   : > { %v591_v58 = vadd.f32 %v574_v45, %v563_v56  ;;  %v564_v59 = vmul.f32 %v748_v55, %v551_v43 }
 0x10d   : > { %595 = vst [vmem:[%s228_s30] sm:$0xff] %v591_v58  ;;  %v592_v61 = vadd.f32 %v579_v57, %v564_v59  ;;  %v749_v62 = vpop.f32.mrb[4].mxu0  ;;  %v773_v63 = vpop.f32.mrb[4].mxu1 }
 0x10e   : > { %v750_v0 = vpop.f32.mrb[5].mxu0  ;;  %v774_v1 = vpop.f32.mrb[5].mxu1 }
 0x10f   : > { %596 = vst [vmem:[%s228_s30 + $0x8] sm:$0xff] %v592_v61  ;;  %v751_v2 = vadd.f32 %v750_v0, %v749_v62  ;;  %v752_v3 = vpop.f32.mrb[6].mxu0  ;;  %v776_v4 = vpop.f32.mrb[6].mxu1 }
 0x110   : > { %v753_v5 = vpop.f32.mrb[7].mxu0  ;;  %v777_v6 = vpop.f32.mrb[7].mxu1 }
 0x111   : > { %v754_v7 = vadd.f32 %v753_v5, %v752_v3  ;;  %v565_v8 = vmul.f32 %v751_v2, %v556_v42 }
 0x113   : > { %v566_v9 = vmul.f32 %v754_v7, %v561_v44  ;;  %v593_v10 = vadd.f32 %v584_v60, %v565_v8 }
 0x115   : > { %v594_v12 = vadd.f32 %v589_v11, %v566_v9  ;;  %597 = vst [vmem:[%s228_s30 + $0x10] sm:$0xff] %v593_v10  ;;  %v755_v13 = vpop.f32.mrb[8].mxu0  ;;  %v779_v14 = vpop.f32.mrb[8].mxu1 }
 0x116   : > { %v756_v15 = vpop.f32.mrb[9].mxu0  ;;  %v780_v16 = vpop.f32.mrb[9].mxu1 }
 0x117   : > { %598 = vst [vmem:[%s228_s30 + $0x18] sm:$0xff] %v594_v12  ;;  %v758_v17 = vpop.f32.mrb[10].mxu0  ;;  %v782_v18 = vpop.f32.mrb[10].mxu1 }
 0x118   : > { %v759_v19 = vpop.f32.mrb[11].mxu0  ;;  %v783_v20 = vpop.f32.mrb[11].mxu1 }
 0x11d   : > { %v761_v21 = vpop.f32.mrb[12].mxu0  ;;  %v785_v22 = vpop.f32.mrb[12].mxu1 }
 0x11e   : > { %v762_v23 = vpop.f32.mrb[13].mxu0  ;;  %v786_v24 = vpop.f32.mrb[13].mxu1 }
 0x11f   : > { %v764_v25 = vpop.f32.mrb[14].mxu0  ;;  %v788_v26 = vpop.f32.mrb[14].mxu1 }
 0x120   : > { %v765_v27 = vpop.f32.mrb[15].mxu0  ;;  %v789_v28 = vpop.f32.mrb[15].mxu1 }
 0x121 PF: > { %s14_s17 = sadd.s32 1, %s896_s17   ;;  %s1056_s15 = smov %s892_s16 }
 0x122   : > { %p11_p5 = scmp.ge.s32.totalorder %s14_s17, 4   ;;  %s1057_s16 = smov %s1059_s18 }
 0x124   :  { %13 = sbr.rel (!%p11_p5) target bundleno = 2 (0x2), region = 66 }

// kernel: overlap_patch_embed.2
= control target key start
LH: loop header
LB: loop body
LE: loop exit
PB: predicated region body
PF: predicated region fallthrough
CT: control target
= control target key end

     0   :  { %s1102_s12 = smov 0   ;;  %s1104_s13 = smov 0   ;;  %s1373_s0 = inlined_call_operand.vmem [shape: bf16[2,256,128], index: 0, kind: input, shape index: {}]   ;;  %s1374_s1 = inlined_call_operand.vmem [shape: bf16[128,256], index: 1, kind: input, shape index: {}]   ;;  %s1375_s2 = inlined_call_operand.vmem [shape: f32[2,128,1], index: 2, kind: output, shape index: {0}]   ;;  %s1376_s3 = inlined_call_operand.vmem [shape: f32[2,128,1], index: 3, kind: output, shape index: {1}]  }
   0x1   :  { %s1106_s14 = smov 0  }
   0x2 LB: > { %s33_s15 = sadd.s32 1, %s1075_s13  ;;  %p868_p0 = scmp.ge.s32.totalorder %s1079_s14, 1  ;;  %s1079_s14 = sphi %s1106_s14, %s14_s14   ;;  %s1075_s13 = sphi %s1104_s13, %s1378_s13   ;;  %s1071_s12 = sphi %s1102_s12, %s1377_s12  }
   0x3   : > { %p35_p1 = scmp.ge.s32.totalorder %s33_s15, 2  ;;  %p168_p2 = scmp.lt.s32.totalorder %s1079_s14, 3 }
   0x5   : > { %s1380_s15 = smov (%p35_p1, %s33_s15), 0  ;;  %p169_p3 = pnand %p868_p0, %p168_p2 }
   0x6   : > { %p202_p4 = scmp.lt.s32.totalorder (!%p169_p3), %s1071_s12, 1  ;;  %v1035_v0 = vld [vmem:[%s1374_s1 + $0x4] ss:$8 sps:$4 sm:$0xff] (!%p169_p3)   ;;  %v1033_v18 = vld [vmem:[%s1374_s1] ss:$8 sps:$4 sm:$0xff] (!%p169_p3)   ;;  %vm228_vm0 = vcmask (!%p169_p3), 7168  }
   0x7   : > { %172 = sbr.rel (%p169_p3) target bundleno = 472 (0x1d8), region = 28  ;;  %v1038_v1 = vld [vmem:[%s1374_s1 + $0x44] ss:$8 sps:$4 sm:$0xff] (!%p169_p3)   ;;  %517 = vmatprep.mubr.bf16.mxu0 (!%p169_p3), %v1035_v0  ;;  %v1036_v19 = vld [vmem:[%s1374_s1 + $0x40] ss:$8 sps:$4 sm:$0xff] (!%p169_p3)   ;;  %v1081_v32 = vmov (!%p169_p3), 0.0  }
   0x8   : > { %549 = vmatprep.mubr.bf16.mxu1 (!%p169_p3), %v1038_v1  ;;  %v1039_v20 = vld [vmem:[%s1374_s1 + $0x14] ss:$8 sps:$4 sm:$0xff] (!%p169_p3)   ;;  %v1041_v22 = vld [vmem:[%s1374_s1 + $0x10] ss:$8 sps:$4 sm:$0xff] (!%p169_p3)   ;;  %v1045_v24 = vld [vmem:[%s1374_s1 + $0x24] ss:$8 sps:$4 sm:$0xff] (!%p169_p3)  }
   0x9   : > { %v1042_v21 = vld [vmem:[%s1374_s1 + $0x54] ss:$8 sps:$4 sm:$0xff] (!%p169_p3)   ;;  %v1044_v23 = vld [vmem:[%s1374_s1 + $0x50] ss:$8 sps:$4 sm:$0xff] (!%p169_p3)   ;;  %v1048_v25 = vld [vmem:[%s1374_s1 + $0x64] ss:$8 sps:$4 sm:$0xff] (!%p169_p3)  }
   0xa   : > { %v1047_v26 = vld [vmem:[%s1374_s1 + $0x20] ss:$8 sps:$4 sm:$0xff] (!%p169_p3)   ;;  %v1051_v28 = vld [vmem:[%s1374_s1 + $0x34] ss:$8 sps:$4 sm:$0xff] (!%p169_p3)   ;;  %v1053_v30 = vld [vmem:[%s1374_s1 + $0x30] ss:$8 sps:$4 sm:$0xff] (!%p169_p3)  }
   0xb   : > { %v1050_v27 = vld [vmem:[%s1374_s1 + $0x60] ss:$8 sps:$4 sm:$0xff] (!%p169_p3)   ;;  %v1054_v29 = vld [vmem:[%s1374_s1 + $0x74] ss:$8 sps:$4 sm:$0xff] (!%p169_p3)   ;;  %v1056_v31 = vld [vmem:[%s1374_s1 + $0x70] ss:$8 sps:$4 sm:$0xff] (!%p169_p3)  }
   0xe   : > { %s1382_s12 = smov (!%p202_p4, %s1071_s12), 1 }
   0xf   : > { %s1126_s20 = sshll.u32 %s1382_s12, 7 }
  0x10   : > { %s1132_s23 = scalar_lea.vmem %s1373_s0, %s1126_s20  ;;  %s1196_s4 = scalar_lea.vmem %s1375_s2, %s1126_s20 }
  0x11   : > { %v1017_v2 = vld [vmem:[%s1132_s23 + $0x40] sm:$0xff]   ;;  %v1019_v4 = vld [vmem:[%s1132_s23 + $0x48] sm:$0xff]   ;;  %v1021_v6 = vld [vmem:[%s1132_s23 + $0x50] sm:$0xff]   ;;  %s1202_s7 = scalar_lea.vmem %s1376_s3, %s1126_s20  ;;  %229 = vst.msk [vmem:[%s1196_s4] sm:$0xff] %vm228_vm0, %v1081_v32 }
  0x12   : > { %v1018_v3 = vld [vmem:[%s1132_s23] sm:$0xff]   ;;  %912 = vmatprep.subr.bf16.mxu0 %v1017_v2  ;;  %976 = vmatprep.subr.bf16.mxu1 %v1017_v2  ;;  %v1020_v5 = vld [vmem:[%s1132_s23 + $0x8] sm:$0xff]   ;;  %v1022_v7 = vld [vmem:[%s1132_s23 + $0x10] sm:$0xff]   ;;  %230 = vst.msk [vmem:[%s1196_s4 + $0x8] sm:$0xff] %vm228_vm0, %v1081_v32 }
  0x13   : > { %913 = vmatpush3.bf16.msra.mxu0 %v1018_v3  ;;  %984 = vmatpush3.bf16.msra.mxu1 %v1018_v3  ;;  %v1023_v8 = vld [vmem:[%s1132_s23 + $0x58] sm:$0xff]   ;;  %v1025_v10 = vld [vmem:[%s1132_s23 + $0x60] sm:$0xff]   ;;  %v1027_v12 = vld [vmem:[%s1132_s23 + $0x68] sm:$0xff]   ;;  %231 = vst.msk [vmem:[%s1196_s4 + $0x10] sm:$0xff] %vm228_vm0, %v1081_v32 }
  0x14   : > { %914 = vmatprep.subr.bf16.mxu0 %v1019_v4  ;;  %977 = vmatprep.subr.bf16.mxu1 %v1019_v4  ;;  %v1024_v9 = vld [vmem:[%s1132_s23 + $0x18] sm:$0xff]   ;;  %v1026_v11 = vld [vmem:[%s1132_s23 + $0x20] sm:$0xff]   ;;  %v1028_v13 = vld [vmem:[%s1132_s23 + $0x28] sm:$0xff]   ;;  %232 = vst.msk [vmem:[%s1196_s4 + $0x18] sm:$0xff] %vm228_vm0, %v1081_v32 }
  0x15   : > { %v1029_v14 = vld [vmem:[%s1132_s23 + $0x70] sm:$0xff]   ;;  %v1031_v16 = vld [vmem:[%s1132_s23 + $0x78] sm:$0xff]   ;;  %233 = vst.msk [vmem:[%s1196_s4 + $0x20] sm:$0xff] %vm228_vm0, %v1081_v32  ;;  %234 = vst.msk [vmem:[%s1196_s4 + $0x28] sm:$0xff] %vm228_vm0, %v1081_v32 }
  0x16   : > { %v1030_v15 = vld [vmem:[%s1132_s23 + $0x30] sm:$0xff]   ;;  %v1032_v17 = vld [vmem:[%s1132_s23 + $0x38] sm:$0xff]   ;;  %235 = vst.msk [vmem:[%s1196_s4 + $0x30] sm:$0xff] %vm228_vm0, %v1081_v32  ;;  %236 = vst.msk [vmem:[%s1196_s4 + $0x38] sm:$0xff] %vm228_vm0, %v1081_v32 }
  0x17   : > { %915 = vmatpush3.bf16.msra.mxu0 %v1020_v5  ;;  %985 = vmatpush3.bf16.msra.mxu1 %v1020_v5  ;;  %237 = vst.msk [vmem:[%s1196_s4 + $0x40] sm:$0xff] %vm228_vm0, %v1081_v32  ;;  %238 = vst.msk [vmem:[%s1196_s4 + $0x48] sm:$0xff] %vm228_vm0, %v1081_v32 }
  0x18   : > { %916 = vmatprep.subr.bf16.mxu0 %v1021_v6  ;;  %978 = vmatprep.subr.bf16.mxu1 %v1021_v6  ;;  %239 = vst.msk [vmem:[%s1196_s4 + $0x50] sm:$0xff] %vm228_vm0, %v1081_v32  ;;  %240 = vst.msk [vmem:[%s1196_s4 + $0x58] sm:$0xff] %vm228_vm0, %v1081_v32 }
  0x19   : > { %241 = vst.msk [vmem:[%s1196_s4 + $0x60] sm:$0xff] %vm228_vm0, %v1081_v32  ;;  %242 = vst.msk [vmem:[%s1196_s4 + $0x68] sm:$0xff] %vm228_vm0, %v1081_v32 }
  0x1a   : > { %243 = vst.msk [vmem:[%s1196_s4 + $0x70] sm:$0xff] %vm228_vm0, %v1081_v32  ;;  %244 = vst.msk [vmem:[%s1196_s4 + $0x78] sm:$0xff] %vm228_vm0, %v1081_v32 }
  0x1b   : > { %917 = vmatpush3.bf16.msra.mxu0 %v1022_v7  ;;  %986 = vmatpush3.bf16.msra.mxu1 %v1022_v7  ;;  %245 = vst.msk [vmem:[%s1202_s7] sm:$0xff] %vm228_vm0, %v1081_v32  ;;  %246 = vst.msk [vmem:[%s1202_s7 + $0x8] sm:$0xff] %vm228_vm0, %v1081_v32 }
  0x1c   : > { %918 = vmatprep.subr.bf16.mxu0 %v1023_v8  ;;  %979 = vmatprep.subr.bf16.mxu1 %v1023_v8  ;;  %247 = vst.msk [vmem:[%s1202_s7 + $0x10] sm:$0xff] %vm228_vm0, %v1081_v32  ;;  %248 = vst.msk [vmem:[%s1202_s7 + $0x18] sm:$0xff] %vm228_vm0, %v1081_v32 }
  0x1d   : > { %249 = vst.msk [vmem:[%s1202_s7 + $0x20] sm:$0xff] %vm228_vm0, %v1081_v32  ;;  %250 = vst.msk [vmem:[%s1202_s7 + $0x28] sm:$0xff] %vm228_vm0, %v1081_v32 }
  0x1e   : > { %251 = vst.msk [vmem:[%s1202_s7 + $0x30] sm:$0xff] %vm228_vm0, %v1081_v32  ;;  %252 = vst.msk [vmem:[%s1202_s7 + $0x38] sm:$0xff] %vm228_vm0, %v1081_v32 }
  0x1f   : > { %919 = vmatpush3.bf16.msra.mxu0 %v1024_v9  ;;  %987 = vmatpush3.bf16.msra.mxu1 %v1024_v9  ;;  %253 = vst.msk [vmem:[%s1202_s7 + $0x40] sm:$0xff] %vm228_vm0, %v1081_v32  ;;  %254 = vst.msk [vmem:[%s1202_s7 + $0x48] sm:$0xff] %vm228_vm0, %v1081_v32 }
  0x20   : > { %920 = vmatprep.subr.bf16.mxu0 %v1025_v10  ;;  %980 = vmatprep.subr.bf16.mxu1 %v1025_v10  ;;  %255 = vst.msk [vmem:[%s1202_s7 + $0x50] sm:$0xff] %vm228_vm0, %v1081_v32  ;;  %256 = vst.msk [vmem:[%s1202_s7 + $0x58] sm:$0xff] %vm228_vm0, %v1081_v32 }
  0x21   : > { %257 = vst.msk [vmem:[%s1202_s7 + $0x60] sm:$0xff] %vm228_vm0, %v1081_v32  ;;  %258 = vst.msk [vmem:[%s1202_s7 + $0x68] sm:$0xff] %vm228_vm0, %v1081_v32 }
  0x22   : > { %259 = vst.msk [vmem:[%s1202_s7 + $0x70] sm:$0xff] %vm228_vm0, %v1081_v32  ;;  %260 = vst.msk [vmem:[%s1202_s7 + $0x78] sm:$0xff] %vm228_vm0, %v1081_v32 }
  0x23   : > { %921 = vmatpush3.bf16.msra.mxu0 %v1026_v11  ;;  %988 = vmatpush3.bf16.msra.mxu1 %v1026_v11 }
  0x24   : > { %922 = vmatprep.subr.bf16.mxu0 %v1027_v12  ;;  %981 = vmatprep.subr.bf16.mxu1 %v1027_v12 }
  0x27   : > { %923 = vmatpush3.bf16.msra.mxu0 %v1028_v13  ;;  %989 = vmatpush3.bf16.msra.mxu1 %v1028_v13 }
  0x28   : > { %924 = vmatprep.subr.bf16.mxu0 %v1029_v14  ;;  %982 = vmatprep.subr.bf16.mxu1 %v1029_v14 }
  0x2b   : > { %925 = vmatpush3.bf16.msra.mxu0 %v1030_v15  ;;  %990 = vmatpush3.bf16.msra.mxu1 %v1030_v15 }
  0x2c   : > { %926 = vmatprep.subr.bf16.mxu0 %v1031_v16  ;;  %983 = vmatprep.subr.bf16.mxu1 %v1031_v16 }
  0x2f   : > { %927 = vmatpush3.bf16.msra.mxu0 %v1032_v17  ;;  %991 = vmatpush3.bf16.msra.mxu1 %v1032_v17 }
  0x32   : > { %518 = vmatmul.mubr.bf16.vlgmr.msra.gmra.mrb[0].mxu0 %v1033_v18  ;;  %550 = vmatmul.mubr.bf16.vlgmr.msra.gmra.mrb[0].mxu1 %v1036_v19 }
  0x33   : > { %525 = vmatprep.mubr.bf16.mxu0 %v1039_v20  ;;  %557 = vmatprep.mubr.bf16.mxu1 %v1042_v21 }
  0x3a   : > { %526 = vmatmul.mubr.bf16.gmra.mrb[4].mxu0 %v1041_v22  ;;  %558 = vmatmul.mubr.bf16.gmra.mrb[4].mxu1 %v1044_v23 }
  0x3b   : > { %533 = vmatprep.mubr.bf16.mxu0 %v1045_v24  ;;  %565 = vmatprep.mubr.bf16.mxu1 %v1048_v25 }
  0x42   : > { %534 = vmatmul.mubr.bf16.gmra.mrb[8].mxu0 %v1047_v26  ;;  %566 = vmatmul.mubr.bf16.gmra.mrb[8].mxu1 %v1050_v27 }
  0x43   : > { %541 = vmatprep.mubr.bf16.mxu0 %v1051_v28  ;;  %573 = vmatprep.mubr.bf16.mxu1 %v1054_v29 }
  0x4a   : > { %542 = vmatmul.mubr.bf16.gmra.mrb[12].mxu0 %v1053_v30  ;;  %574 = vmatmul.mubr.bf16.gmra.mrb[12].mxu1 %v1056_v31 }
 0x105   : > { %v928_v33 = vpop.f32.mrb[0].mxu0  ;;  %v952_v34 = vpop.f32.mrb[0].mxu1 }
 0x106   : > { %v929_v35 = vpop.f32.mrb[1].mxu0  ;;  %v953_v36 = vpop.f32.mrb[1].mxu1 }
 0x107   : > { %v930_v37 = vadd.f32 %v929_v35, %v928_v33  ;;  %v954_v38 = vadd.f32 %v953_v36, %v952_v34  ;;  %v931_v39 = vpop.f32.mrb[2].mxu0  ;;  %v955_v40 = vpop.f32.mrb[2].mxu1  ;;  %v582_v33 = vld [vmem:[%s1196_s4] sm:$0xff]  ;;  %v591_v35 = vld [vmem:[%s1196_s4 + $0x48] sm:$0xff] }
 0x108   : > { %v932_v41 = vpop.f32.mrb[3].mxu0  ;;  %v956_v42 = vpop.f32.mrb[3].mxu1 }
 0x109   : > { %v933_v43 = vadd.f32 %v932_v41, %v931_v39  ;;  %v957_v44 = vadd.f32 %v956_v42, %v955_v40  ;;  %598 = vadd.xlane.f32.xlu0 %v930_v37  ;;  %v679_v59 = vmul.f32 %v930_v37, %v930_v37  ;;  %v687_v0 = vmul.f32 %v954_v38, %v954_v38  ;;  %v664_v41 = vld [vmem:[%s1202_s7 + $0x8] sm:$0xff] }
 0x10b   : > { %616 = vadd.xlane.f32.xlu1 %v957_v44  ;;  %v680_v45 = vmul.f32 %v933_v43, %v933_v43  ;;  %v688_v57 = vmul.f32 %v957_v44, %v957_v44  ;;  %v583_v44 = vld [vmem:[%s1196_s4 + $0x8] sm:$0xff] }
 0x10d   : > { %614 = vadd.xlane.f32.xlu0 %v954_v38  ;;  %v934_v46 = vpop.f32.mrb[4].mxu0  ;;  %v958_v47 = vpop.f32.mrb[4].mxu1  ;;  %v590_v38 = vld [vmem:[%s1196_s4 + $0x40] sm:$0xff] }
 0x10e   : > { %v935_v48 = vpop.f32.mrb[5].mxu0  ;;  %v959_v49 = vpop.f32.mrb[5].mxu1 }
 0x10f   : > { %697 = vadd.xlane.f32.xlu1 %v680_v45  ;;  %v936_v50 = vadd.f32 %v935_v48, %v934_v46  ;;  %v937_v51 = vpop.f32.mrb[6].mxu0  ;;  %v960_v52 = vadd.f32 %v959_v49, %v958_v47  ;;  %v961_v53 = vpop.f32.mrb[6].mxu1  ;;  %v672_v47 = vld [vmem:[%s1202_s7 + $0x48] sm:$0xff] }
 0x110   : > { %v938_v54 = vpop.f32.mrb[7].mxu0  ;;  %v962_v55 = vpop.f32.mrb[7].mxu1 }
 0x111   : > { %600 = vadd.xlane.f32.xlu0 %v933_v43  ;;  %v939_v56 = vadd.f32 %v938_v54, %v937_v51  ;;  %v963_v58 = vadd.f32 %v962_v55, %v961_v53  ;;  %v681_v13 = vmul.f32 %v936_v50, %v936_v50  ;;  %v689_v23 = vmul.f32 %v960_v52, %v960_v52  ;;  %v584_v53 = vld [vmem:[%s1196_s4 + $0x10] sm:$0xff] }
 0x113   : > { %713 = vadd.xlane.f32.xlu1 %v688_v57  ;;  %v682_v20 = vmul.f32 %v939_v56, %v939_v56  ;;  %v690_v24 = vmul.f32 %v963_v58, %v963_v58 }
 0x115   : > { %695 = vadd.xlane.f32.xlu0 %v679_v59  ;;  %v940_v60 = vpop.f32.mrb[8].mxu0  ;;  %v964_v61 = vpop.f32.mrb[8].mxu1  ;;  %v585_v59 = vld [vmem:[%s1196_s4 + $0x18] sm:$0xff] }
 0x116   : > { %v941_v62 = vpop.f32.mrb[9].mxu0  ;;  %v965_v63 = vpop.f32.mrb[9].mxu1 }
 0x117   : > { %602 = vadd.xlane.f32.xlu1 %v936_v50  ;;  %v942_v1 = vadd.f32 %v941_v62, %v940_v60  ;;  %v943_v2 = vpop.f32.mrb[10].mxu0  ;;  %v966_v3 = vadd.f32 %v965_v63, %v964_v61  ;;  %v967_v4 = vpop.f32.mrb[10].mxu1  ;;  %v663_v50 = vld [vmem:[%s1202_s7] sm:$0xff]  ;;  %v592_v62 = vld [vmem:[%s1196_s4 + $0x50] sm:$0xff] }
 0x118   : > { %v944_v5 = vpop.f32.mrb[11].mxu0  ;;  %v968_v6 = vpop.f32.mrb[11].mxu1 }
 0x119   : > { %711 = vadd.xlane.f32.xlu0 %v687_v0  ;;  %v945_v7 = vadd.f32 %v944_v5, %v943_v2  ;;  %v969_v8 = vadd.f32 %v968_v6, %v967_v4  ;;  %v683_v25 = vmul.f32 %v942_v1, %v942_v1  ;;  %v691_v27 = vmul.f32 %v966_v3, %v966_v3  ;;  %v665_v4 = vld [vmem:[%s1202_s7 + $0x10] sm:$0xff] }
 0x11b   : > { %604 = vadd.xlane.f32.xlu1 %v939_v56  ;;  %v684_v26 = vmul.f32 %v945_v7, %v945_v7  ;;  %v692_v28 = vmul.f32 %v969_v8, %v969_v8  ;;  %v671_v56 = vld [vmem:[%s1202_s7 + $0x40] sm:$0xff] }
 0x11d   : > { %618 = vadd.xlane.f32.xlu0 %v960_v52  ;;  %v946_v9 = vpop.f32.mrb[12].mxu0  ;;  %v970_v10 = vpop.f32.mrb[12].mxu1 }
 0x11e   : > { %v947_v11 = vpop.f32.mrb[13].mxu0  ;;  %v971_v12 = vpop.f32.mrb[13].mxu1 }
 0x11f   : > { %620 = vadd.xlane.f32.xlu1 %v963_v58  ;;  %v948_v14 = vadd.f32 %v947_v11, %v946_v9  ;;  %v949_v15 = vpop.f32.mrb[14].mxu0  ;;  %v972_v16 = vadd.f32 %v971_v12, %v970_v10  ;;  %v973_v17 = vpop.f32.mrb[14].mxu1  ;;  %v673_v10 = vld [vmem:[%s1202_s7 + $0x50] sm:$0xff] }
 0x120   : > { %v950_v18 = vpop.f32.mrb[15].mxu0  ;;  %v974_v19 = vpop.f32.mrb[15].mxu1 }
 0x121   : > { %699 = vadd.xlane.f32.xlu0 %v681_v13  ;;  %v951_v21 = vadd.f32 %v950_v18, %v949_v15  ;;  %v975_v22 = vadd.f32 %v974_v19, %v973_v17  ;;  %v685_v29 = vmul.f32 %v948_v14, %v948_v14  ;;  %v693_v31 = vmul.f32 %v972_v16, %v972_v16  ;;  %v674_v13 = vld [vmem:[%s1202_s7 + $0x58] sm:$0xff]  ;;  %v587_v19 = vld [vmem:[%s1196_s4 + $0x28] sm:$0xff] }
 0x123   : > { %701 = vadd.xlane.f32.xlu1 %v682_v20  ;;  %v686_v30 = vmul.f32 %v951_v21, %v951_v21  ;;  %v694_v32 = vmul.f32 %v975_v22, %v975_v22 }
 0x125   : > { %715 = vadd.xlane.f32.xlu0 %v689_v23 }
 0x127   : > { %717 = vadd.xlane.f32.xlu1 %v690_v24 }
 0x129   : > { %606 = vadd.xlane.f32.xlu0 %v942_v1  ;;  %v593_v1 = vld [vmem:[%s1196_s4 + $0x58] sm:$0xff] }
 0x12b   : > { %608 = vadd.xlane.f32.xlu1 %v945_v7  ;;  %v666_v7 = vld [vmem:[%s1202_s7 + $0x18] sm:$0xff] }
 0x12d   : > { %622 = vadd.xlane.f32.xlu0 %v966_v3 }
 0x12f   : > { %624 = vadd.xlane.f32.xlu1 %v969_v8 }
 0x131   : > { %703 = vadd.xlane.f32.xlu0 %v683_v25  ;;  %v595_v25 = vld [vmem:[%s1196_s4 + $0x68] sm:$0xff] }
 0x133   : > { %705 = vadd.xlane.f32.xlu1 %v684_v26 }
 0x135   : > { %719 = vadd.xlane.f32.xlu0 %v691_v27 }
 0x137   : > { %721 = vadd.xlane.f32.xlu1 %v692_v28  ;;  %v667_v28 = vld [vmem:[%s1202_s7 + $0x20] sm:$0xff] }
 0x139   : > { %610 = vadd.xlane.f32.xlu0 %v948_v14 }
 0x13b   : > { %612 = vadd.xlane.f32.xlu1 %v951_v21 }
 0x13d   : > { %626 = vadd.xlane.f32.xlu0 %v972_v16  ;;  %v586_v16 = vld [vmem:[%s1196_s4 + $0x20] sm:$0xff] }
 0x13f   : > { %628 = vadd.xlane.f32.xlu1 %v975_v22  ;;  %v594_v22 = vld [vmem:[%s1196_s4 + $0x60] sm:$0xff] }
 0x141   : > { %707 = vadd.xlane.f32.xlu0 %v685_v29 }
 0x143   : > { %709 = vadd.xlane.f32.xlu1 %v686_v30 }
 0x145   : > { %723 = vadd.xlane.f32.xlu0 %v693_v31  ;;  %v668_v31 = vld [vmem:[%s1202_s7 + $0x28] sm:$0xff] }
 0x147   : > { %725 = vadd.xlane.f32.xlu1 %v694_v32 }
 0x196   : > { %v599_v34 = vpop.xlane.xlu0 %598 }
 0x197   : > { %v630_v36 = vadd.f32 %v599_v34, %v582_v33  ;;  %v675_v34 = vld [vmem:[%s1202_s7 + $0x60] sm:$0xff] }
 0x198   : > { %v617_v37 = vpop.xlane.xlu1 %616 }
 0x199   : > { %647 = vst.msk [vmem:[%s1196_s4] sm:$0xff] %vm228_vm0, %v630_v36  ;;  %v639_v39 = vadd.f32 %v617_v37, %v591_v35  ;;  %v676_v37 = vld [vmem:[%s1202_s7 + $0x68] sm:$0xff] }
 0x19a   : > { %v615_v40 = vpop.xlane.xlu0 %614 }
 0x19b   : > { %656 = vst.msk [vmem:[%s1196_s4 + $0x48] sm:$0xff] %vm228_vm0, %v639_v39  ;;  %v638_v42 = vadd.f32 %v615_v40, %v590_v38  ;;  %v588_v40 = vld [vmem:[%s1196_s4 + $0x30] sm:$0xff] }
 0x19c   : > { %v698_v43 = vpop.xlane.xlu1 %697 }
 0x19d   : > { %655 = vst.msk [vmem:[%s1196_s4 + $0x40] sm:$0xff] %vm228_vm0, %v638_v42  ;;  %v728_v45 = vadd.f32 %v698_v43, %v664_v41  ;;  %v589_v43 = vld [vmem:[%s1196_s4 + $0x38] sm:$0xff] }
 0x19e   : > { %v601_v46 = vpop.xlane.xlu0 %600 }
 0x19f   : > { %744 = vst.msk [vmem:[%s1202_s7 + $0x8] sm:$0xff] %vm228_vm0, %v728_v45  ;;  %v631_v48 = vadd.f32 %v601_v46, %v583_v44  ;;  %v596_v46 = vld [vmem:[%s1196_s4 + $0x70] sm:$0xff] }
 0x1a0   : > { %v714_v49 = vpop.xlane.xlu1 %713 }
 0x1a1   : > { %648 = vst.msk [vmem:[%s1196_s4 + $0x8] sm:$0xff] %vm228_vm0, %v631_v48  ;;  %v736_v51 = vadd.f32 %v714_v49, %v672_v47  ;;  %v597_v49 = vld [vmem:[%s1196_s4 + $0x78] sm:$0xff] }
 0x1a2   : > { %v696_v52 = vpop.xlane.xlu0 %695 }
 0x1a3   : > { %752 = vst.msk [vmem:[%s1202_s7 + $0x48] sm:$0xff] %vm228_vm0, %v736_v51  ;;  %v727_v54 = vadd.f32 %v696_v52, %v663_v50  ;;  %v669_v52 = vld [vmem:[%s1202_s7 + $0x30] sm:$0xff] }
 0x1a4   : > { %v603_v55 = vpop.xlane.xlu1 %602 }
 0x1a5   : > { %743 = vst.msk [vmem:[%s1202_s7] sm:$0xff] %vm228_vm0, %v727_v54  ;;  %v632_v57 = vadd.f32 %v603_v55, %v584_v53  ;;  %v670_v55 = vld [vmem:[%s1202_s7 + $0x38] sm:$0xff] }
 0x1a6   : > { %v712_v58 = vpop.xlane.xlu0 %711 }
 0x1a7   : > { %649 = vst.msk [vmem:[%s1196_s4 + $0x10] sm:$0xff] %vm228_vm0, %v632_v57  ;;  %v735_v60 = vadd.f32 %v712_v58, %v671_v56  ;;  %v677_v58 = vld [vmem:[%s1202_s7 + $0x70] sm:$0xff] }
 0x1a8   : > { %v605_v61 = vpop.xlane.xlu1 %604 }
 0x1a9   : > { %751 = vst.msk [vmem:[%s1202_s7 + $0x40] sm:$0xff] %vm228_vm0, %v735_v60  ;;  %v633_v63 = vadd.f32 %v605_v61, %v585_v59  ;;  %v678_v61 = vld [vmem:[%s1202_s7 + $0x78] sm:$0xff] }
 0x1aa   : > { %v619_v0 = vpop.xlane.xlu0 %618 }
 0x1ab   : > { %650 = vst.msk [vmem:[%s1196_s4 + $0x18] sm:$0xff] %vm228_vm0, %v633_v63  ;;  %v640_v2 = vadd.f32 %v619_v0, %v592_v62 }
 0x1ac   : > { %v621_v3 = vpop.xlane.xlu1 %620 }
 0x1ad   : > { %657 = vst.msk [vmem:[%s1196_s4 + $0x50] sm:$0xff] %vm228_vm0, %v640_v2  ;;  %v641_v5 = vadd.f32 %v621_v3, %v593_v1 }
 0x1ae   : > { %v700_v6 = vpop.xlane.xlu0 %699 }
 0x1af   : > { %658 = vst.msk [vmem:[%s1196_s4 + $0x58] sm:$0xff] %vm228_vm0, %v641_v5  ;;  %v729_v8 = vadd.f32 %v700_v6, %v665_v4 }
 0x1b0   : > { %v702_v9 = vpop.xlane.xlu1 %701 }
 0x1b1   : > { %745 = vst.msk [vmem:[%s1202_s7 + $0x10] sm:$0xff] %vm228_vm0, %v729_v8  ;;  %v730_v11 = vadd.f32 %v702_v9, %v666_v7 }
 0x1b2   : > { %v716_v12 = vpop.xlane.xlu0 %715 }
 0x1b3   : > { %746 = vst.msk [vmem:[%s1202_s7 + $0x18] sm:$0xff] %vm228_vm0, %v730_v11  ;;  %v737_v14 = vadd.f32 %v716_v12, %v673_v10 }
 0x1b4   : > { %v718_v15 = vpop.xlane.xlu1 %717 }
 0x1b5   : > { %753 = vst.msk [vmem:[%s1202_s7 + $0x50] sm:$0xff] %vm228_vm0, %v737_v14  ;;  %v738_v17 = vadd.f32 %v718_v15, %v674_v13 }
 0x1b6   : > { %v607_v18 = vpop.xlane.xlu0 %606 }
 0x1b7   : > { %754 = vst.msk [vmem:[%s1202_s7 + $0x58] sm:$0xff] %vm228_vm0, %v738_v17  ;;  %v634_v20 = vadd.f32 %v607_v18, %v586_v16 }
 0x1b8   : > { %v609_v21 = vpop.xlane.xlu1 %608 }
 0x1b9   : > { %651 = vst.msk [vmem:[%s1196_s4 + $0x20] sm:$0xff] %vm228_vm0, %v634_v20  ;;  %v635_v23 = vadd.f32 %v609_v21, %v587_v19 }
 0x1ba   : > { %v623_v24 = vpop.xlane.xlu0 %622 }
 0x1bb   : > { %652 = vst.msk [vmem:[%s1196_s4 + $0x28] sm:$0xff] %vm228_vm0, %v635_v23  ;;  %v642_v26 = vadd.f32 %v623_v24, %v594_v22 }
 0x1bc   : > { %v625_v27 = vpop.xlane.xlu1 %624 }
 0x1bd   : > { %659 = vst.msk [vmem:[%s1196_s4 + $0x60] sm:$0xff] %vm228_vm0, %v642_v26  ;;  %v643_v29 = vadd.f32 %v625_v27, %v595_v25 }
 0x1be   : > { %v704_v30 = vpop.xlane.xlu0 %703 }
 0x1bf   : > { %660 = vst.msk [vmem:[%s1196_s4 + $0x68] sm:$0xff] %vm228_vm0, %v643_v29  ;;  %v731_v32 = vadd.f32 %v704_v30, %v667_v28 }
 0x1c0   : > { %v706_v33 = vpop.xlane.xlu1 %705 }
 0x1c1   : > { %747 = vst.msk [vmem:[%s1202_s7 + $0x20] sm:$0xff] %vm228_vm0, %v731_v32  ;;  %v732_v35 = vadd.f32 %v706_v33, %v668_v31 }
 0x1c2   : > { %v720_v36 = vpop.xlane.xlu0 %719 }
 0x1c3   : > { %748 = vst.msk [vmem:[%s1202_s7 + $0x28] sm:$0xff] %vm228_vm0, %v732_v35  ;;  %v739_v38 = vadd.f32 %v720_v36, %v675_v34 }
 0x1c4   : > { %v722_v39 = vpop.xlane.xlu1 %721 }
 0x1c5   : > { %755 = vst.msk [vmem:[%s1202_s7 + $0x60] sm:$0xff] %vm228_vm0, %v739_v38  ;;  %v740_v41 = vadd.f32 %v722_v39, %v676_v37 }
 0x1c6   : > { %v611_v42 = vpop.xlane.xlu0 %610 }
 0x1c7   : > { %756 = vst.msk [vmem:[%s1202_s7 + $0x68] sm:$0xff] %vm228_vm0, %v740_v41  ;;  %v636_v44 = vadd.f32 %v611_v42, %v588_v40 }
 0x1c8   : > { %v613_v45 = vpop.xlane.xlu1 %612 }
 0x1c9   : > { %653 = vst.msk [vmem:[%s1196_s4 + $0x30] sm:$0xff] %vm228_vm0, %v636_v44  ;;  %v637_v47 = vadd.f32 %v613_v45, %v589_v43 }
 0x1ca   : > { %v627_v48 = vpop.xlane.xlu0 %626 }
 0x1cb   : > { %654 = vst.msk [vmem:[%s1196_s4 + $0x38] sm:$0xff] %vm228_vm0, %v637_v47  ;;  %v644_v50 = vadd.f32 %v627_v48, %v596_v46 }
 0x1cc   : > { %v629_v51 = vpop.xlane.xlu1 %628 }
 0x1cd   : > { %661 = vst.msk [vmem:[%s1196_s4 + $0x70] sm:$0xff] %vm228_vm0, %v644_v50  ;;  %v645_v53 = vadd.f32 %v629_v51, %v597_v49 }
 0x1ce   : > { %v708_v54 = vpop.xlane.xlu0 %707 }
 0x1cf   : > { %662 = vst.msk [vmem:[%s1196_s4 + $0x78] sm:$0xff] %vm228_vm0, %v645_v53  ;;  %v733_v56 = vadd.f32 %v708_v54, %v669_v52 }
 0x1d0   : > { %v710_v57 = vpop.xlane.xlu1 %709 }
 0x1d1   : > { %749 = vst.msk [vmem:[%s1202_s7 + $0x30] sm:$0xff] %vm228_vm0, %v733_v56  ;;  %v734_v59 = vadd.f32 %v710_v57, %v670_v55 }
 0x1d2   : > { %v724_v60 = vpop.xlane.xlu0 %723 }
 0x1d3   : > { %750 = vst.msk [vmem:[%s1202_s7 + $0x38] sm:$0xff] %vm228_vm0, %v734_v59  ;;  %v741_v62 = vadd.f32 %v724_v60, %v677_v58 }
 0x1d4   : > { %v726_v63 = vpop.xlane.xlu1 %725 }
 0x1d5   : > { %757 = vst.msk [vmem:[%s1202_s7 + $0x70] sm:$0xff] %vm228_vm0, %v741_v62  ;;  %v742_v0 = vadd.f32 %v726_v63, %v678_v61 }
 0x1d7   : > { %758 = vst.msk [vmem:[%s1202_s7 + $0x78] sm:$0xff] %vm228_vm0, %v742_v0 }
 0x1d8 PF: > { %s14_s14 = sadd.s32 1, %s1079_s14   ;;  %s1377_s12 = smov %s1075_s13 }
 0x1d9   : > { %p11_p5 = scmp.ge.s32.totalorder %s14_s14, 4   ;;  %s1378_s13 = smov %s1380_s15 }
 0x1db   :  { %13 = sbr.rel (!%p11_p5) target bundleno = 2 (0x2), region = 74 }

</bundles_post_ra>
